<compile_context>
chip_gen: v7x
topology: tpu7x:2x2x1
jax: 0.10.0
libtpu: 0.0.40
codegen_flags: <defaults>
</compile_context>

<pallas_src>
import jax
import jax.numpy as jnp
from jax.experimental import pallas as pl
from jax.experimental.pallas import tpu as pltpu


def simple_gate_kernel(x_ref, o_ref):
    # x_ref: (1, 2, c_tile, s_tile) -- both channel halves of this tile.
    # o_ref: (1, 1, c_tile, s_tile)
    o_ref[0, 0] = x_ref[0, 0] * x_ref[0, 1]


_MAX_LANE_TILE = 8192  # lanes per block (multiple of 128)


def _sublane_step(dtype):
    """Minimum efficient sublane tile: 8 rows for 32-bit, 16 bf16, 32 int8/fp8."""
    itemsize = jnp.dtype(dtype).itemsize
    return max(8, 32 // max(1, itemsize))


def _block_byte_target():
    """Per-output-block byte budget.

    Steady-state VMEM ~= 6x this (double-buffered 2x-wide input + output), so
    2 MiB fits v5e's 16 MiB scoped default and 4 MiB fits the 32 MiB default
    on v6e / v7x without any vmem_limit_bytes override.
    """
    try:
        kind = jax.devices()[0].device_kind.lower()
    except Exception:
        kind = ""
    if "v6" in kind or "v7" in kind:
        return 4 << 20
    return 2 << 20  # conservative default (v5e and unknown chips)


def _pick_tile(dim, step, max_tile):
    """step-aligned tile <= min(dim, max_tile); full extent when dim < step."""
    if dim < step:
        return dim  # full-extent block satisfies the (8, 128) tiling rule
    cap = max(step, (max_tile // step) * step)
    aligned = (dim // step) * step
    return min(cap, aligned)


def simple_gate(x):
    """SimpleGate forward (dim=1): split channels into halves, multiply."""
    B, C, H, W = x.shape
    assert C % 2 == 0, "SimpleGate requires an even number of channels"
    c_half = C // 2
    S = H * W
    itemsize = jnp.dtype(x.dtype).itemsize

    # Free view of contiguous NCHW data: split channels into (2, c_half) and
    # merge the spatial dims into a lane-dense last axis.
    x4 = x.reshape(B, 2, c_half, S)

    # --- tile selection ------------------------------------------------------
    target_bytes = _block_byte_target()
    c_step = _sublane_step(x.dtype)
    s_tile = _pick_tile(S, 128, _MAX_LANE_TILE)
    max_rows = max(c_step, target_bytes // max(1, s_tile * itemsize))
    c_tile = _pick_tile(c_half, c_step, max_rows)

    # Keep >= 2 grid steps so both v7x TensorCores get work (no-op on 1-TC chips).
    def n_steps(ct, st):
        return B * pl.cdiv(c_half, ct) * pl.cdiv(S, st)

    while n_steps(c_tile, s_tile) < 2:
        if s_tile >= 256:
            s_tile = ((s_tile // 2) // 128) * 128
        elif c_tile >= 2 * c_step:
            c_tile = ((c_tile // 2) // c_step) * c_step
        else:
            break

    grid = (B, pl.cdiv(c_half, c_tile), pl.cdiv(S, s_tile))

    out4 = pl.pallas_call(
        simple_gate_kernel,
        out_shape=jax.ShapeDtypeStruct((B, 1, c_half, S), x.dtype),
        grid=grid,
        in_specs=[
            # One DMA per step carrying BOTH channel halves of the tile.
            pl.BlockSpec((1, 2, c_tile, s_tile), lambda b, c, s: (b, 0, c, s)),
        ],
        out_specs=pl.BlockSpec((1, 1, c_tile, s_tile), lambda b, c, s: (b, 0, c, s)),
        compiler_params=pltpu.CompilerParams(
            dimension_semantics=("parallel", "parallel", "parallel"),
        ),
    )(x4)

    return out4.reshape(B, c_half, H, W)


if __name__ == "__main__":
    key = jax.random.PRNGKey(0)

    # Small NCHW input consistent with the module (channels must be even).
    x = jax.random.normal(key, (2, 4, 16, 16), dtype=jnp.float32)
    out = jax.block_until_ready(simple_gate(x))
    x1, x2 = jnp.split(x, 2, axis=1)
    assert out.shape == (2, 2, 16, 16)
    assert jnp.allclose(out, x1 * x2, atol=1e-6, rtol=1e-6)

    # Multi-row (8,128)-aligned path.
    x_b = jax.random.normal(jax.random.PRNGKey(1), (2, 32, 32, 32), dtype=jnp.float32)
    out_b = jax.block_until_ready(simple_gate(x_b))
    x1_b, x2_b = jnp.split(x_b, 2, axis=1)
    assert jnp.allclose(out_b, x1_b * x2_b, atol=1e-6, rtol=1e-6)

    # Non-aligned spatial size + bf16: exercises partial boundary blocks and
    # the dtype-aware sublane step.
    x_c = jax.random.normal(jax.random.PRNGKey(2), (1, 12, 10, 14), dtype=jnp.bfloat16)
    out_c = jax.block_until_ready(simple_gate(x_c))
    x1_c, x2_c = jnp.split(x_c, 2, axis=1)
    assert out_c.shape == (1, 6, 10, 14)
    assert jnp.allclose(out_c.astype(jnp.float32),
                        (x1_c * x2_c).astype(jnp.float32),
                        atol=1e-2, rtol=1e-2)

    print("KERNEL_OK")
</pallas_src>

<mosaic_0001>
module attributes {stable_mosaic.version = 11 : i64} {
  func.func @simple_gate_kernel(%arg0: i32, %arg1: i32, %arg2: i32, %arg3: memref<1x2x2x256xf32, #tpu.memory_space<vmem>>, %arg4: memref<1x1x2x256xf32, #tpu.memory_space<vmem>>) attributes {dimension_semantics = [#tpu.dimension_semantics<parallel>, #tpu.dimension_semantics<parallel>, #tpu.dimension_semantics<parallel>], iteration_bounds = array<i64: 2, 1, 1>, scalar_prefetch = 0 : i64, scratch_operands = 0 : i64, tpu.core_type = #tpu.core_type<tc>, window_params = [{transform_indices = @transform_0, window_bounds = array<i64: 1, 2, 2, 256>}, {transform_indices = @transform_1, window_bounds = array<i64: 1, 1, 2, 256>}]} {
    %c0 = arith.constant 0 : index
    %c0_0 = arith.constant 0 : index
    %c0_1 = arith.constant 0 : index
    %c0_2 = arith.constant 0 : index
    %0 = vector.load %arg3[%c0, %c0_0, %c0_1, %c0_2] : memref<1x2x2x256xf32, #tpu.memory_space<vmem>>, vector<1x1x2x256xf32>
    %1 = vector.shape_cast %0 : vector<1x1x2x256xf32> to vector<2x256xf32>
    %c0_3 = arith.constant 0 : index
    %c1 = arith.constant 1 : index
    %c0_4 = arith.constant 0 : index
    %c0_5 = arith.constant 0 : index
    %2 = vector.load %arg3[%c0_3, %c1, %c0_4, %c0_5] : memref<1x2x2x256xf32, #tpu.memory_space<vmem>>, vector<1x1x2x256xf32>
    %3 = vector.shape_cast %2 : vector<1x1x2x256xf32> to vector<2x256xf32>
    %4 = arith.mulf %1, %3 : vector<2x256xf32>
    %c0_6 = arith.constant 0 : index
    %c0_7 = arith.constant 0 : index
    %c0_8 = arith.constant 0 : index
    %c0_9 = arith.constant 0 : index
    %5 = vector.load %arg4[%c0_6, %c0_7, %c0_8, %c0_9] : memref<1x1x2x256xf32, #tpu.memory_space<vmem>>, vector<1x1x2x256xf32>
    %6 = vector.shape_cast %5 : vector<1x1x2x256xf32> to vector<2x256xf32>
    %7 = vector.shape_cast %4 : vector<2x256xf32> to vector<1x1x2x256xf32>
    tpu.vector_store %arg4[%c0_6, %c0_7, %c0_8, %c0_9], %7 {strides = array<i32>} : memref<1x1x2x256xf32, #tpu.memory_space<vmem>>, vector<1x1x2x256xf32>,
    return
  }
  func.func @transform_0(%arg0: i32, %arg1: i32, %arg2: i32) -> (i32, i32, i32, i32) {
    %c0_i32 = arith.constant 0 : i32
    %c0_i32_0 = arith.constant 0 : i32
    return %arg0, %c0_i32, %arg1, %arg2 : i32, i32, i32, i32
  }
  func.func @transform_1(%arg0: i32, %arg1: i32, %arg2: i32) -> (i32, i32, i32, i32) {
    %c0_i32 = arith.constant 0 : i32
    %c0_i32_0 = arith.constant 0 : i32
    return %arg0, %c0_i32, %arg1, %arg2 : i32, i32, i32, i32
  }
}

</mosaic_0001>

<bundles_post_ra>
// kernel: tpu_custom_call.1
= control target key start
LH: loop header
LB: loop body
LE: loop exit
PB: predicated region body
PF: predicated region fallthrough
CT: control target
= control target key end

     0   :  { %6 = vsyncpa [#allocation3], 0  ;;  %s667_s0 = inlined_call_operand.hbm [shape: f32[2,2,2,256], index: 0, kind: input, shape index: {}]   ;;  %s668_s1 = inlined_call_operand.hbm [shape: f32[2,1,2,256], index: 1, kind: output, shape index: {}]  }
   0x1   :  { %8 = vsyncpa [#allocation3 + $0x1], 0 }
   0x2   :  { %9 = vsyncpa [#allocation4], 0 }
   0x3   :  { %11 = vsyncpa [#allocation4 + $0x1], 0  ;;  %s493_s6 = smov 0   ;;  %s495_s7 = smov 0  }
   0x4   :  { %s497_s8 = smov 0   ;;  %s499_s9 = smov 0  }
   0x5   :  { %s501_s10 = smov 0   ;;  %s503_s11 = smov 0  }
   0x6 LB: > { %s283_s12 = sadd.s32 4294967295, %s477_s11   ;;  %s284_s13 = sadd.s32 4294967294, %s477_s11   ;;  %s477_s11 = sphi %s503_s11, %s17_s11   ;;  %s473_s10 = sphi %s501_s10, %s683_s10   ;;  %s469_s9 = sphi %s499_s9, %s682_s9   ;;  %s465_s8 = sphi %s497_s8, %s681_s8   ;;  %s461_s7 = sphi %s495_s7, %s680_s7   ;;  %s457_s6 = sphi %s493_s6, %s679_s6  }
   0x7   : > { %s36_s14 = sadd.s32 1, %s473_s10  ;;  %s47_s15 = sadd.s32 1, %s465_s8 }
   0x8   : > { %p38_p0 = scmp.ge.s32.totalorder %s36_s14, 2  ;;  %p54_p1 = scmp.ne.s32.totalorder %s465_s8, %s461_s7 }
   0x9   : > { %p55_p2 = scmp.eq.s32.totalorder %s477_s11, 0  ;;  %p60_p3 = scmp.ne.s32.totalorder %s461_s7, %s457_s6 }
   0xa   : > { %s685_s14 = smov (%p38_p0, %s36_s14), 0  ;;  %p61_p5 = scmp.eq.s32.totalorder %s283_s12, 0 }
   0xb   : > { %p534_p4 = por %p55_p2, %p54_p1  ;;  %s40_s17 = ssub.s32 %s473_s10, %s685_s14 }
   0xc   : > { %p88_p6 = scmp.eq.s32.totalorder %s283_s12, 1  ;;  %p45_p7 = scmp.eq.s32.totalorder %s40_s17, 0 }
   0xd   : > { %p540_p8 = por %p61_p5, %p60_p3  ;;  %p94_p10 = scmp.eq.s32.totalorder %s284_s13, 1 }
   0xe   : > { %p544_p9 = por %p88_p6, %p54_p1  ;;  %p313_p13 = scmp.lt.s32.totalorder %s477_s11, 2 }
   0xf   : > { %s549_s20 = scalar_select %p45_p7, %s465_s8, %s47_s15  }
  0x10   : > { %s672_s19 = scalar_select %p544_p9, 1, 0 }
  0x11   : > { %p551_p11 = por %p94_p10, %p60_p3  ;;  %s114_s22 = sand.u32 1, %s465_s8  }
  0x12   : > { %s287_s23 = sshll.u32 %s114_s22, 3  ;;  %s299_s24 = sshll.u32 %s473_s10, 7 }
  0x13   : > { %s673_s21 = scalar_select %p551_p11, 1, 0 }
  0x14   : > { %s562_s27 = scalar_lea.hbm %s667_s0, %s299_s24  ;;  %s118_s28 = scalar_lea.vmem [#allocation2], %s287_s23 }
  0x15   : > { %s129_s29 = sshll.u32 %s118_s28, 4  ;;  %p568_p0 = pnand %p313_p13, %p534_p4  ;;  %s564_s29 = int_to_ptr.vmem [resolvable:$true] %s129_s29 }
  0x16   : > { %s573_s2 = scalar_lea.sflag [#allocation3], %s114_s22  ;;  %s365_s3 = scalar_lea.hbm %s562_s27, 128 }
  0x17   : > { %p366_p2 = scmp.ne.s32.totalorder %s562_s27, %s365_s3  ;;  %p367_p3 = pneg %p568_p0 }
  0x18   : > { %s370_s12 = scalar_lea.hbm %s667_s0, 256  ;;  %p371_p4 = scmp.lt.u32.totalorder %s562_s27, %s667_s0 }
  0x19   : > { %p368_p5 = pnand %p367_p3, %p366_p2  ;;  %p372_p7 = scmp.lt.u32.totalorder %s370_s12, %s365_s3 }
  0x1a   : > { %p374_p13 = scmp.lt.u32.totalorder %s365_s3, %s562_s27 }
  0x1b   : > { %p369_p6 = pneg %p368_p5  ;;  %p373_p10 = por %p372_p7, %p371_p4 }
  0x1d   : > { %p375_p12 = por %p374_p13, %p373_p10 }
  0x1f   : > { %p376_p1 = pnand %p375_p12, %p369_p6 }
  0x21   : > { %379 = shalt.err (!%p376_p1)
}
  0x22   : > { %s380_s16 = scalar_lea.vmem %s564_s29, 128  ;;  %s479_s17 = smov [#allocation2]  }
  0x23   : > { %p381_p2 = scmp.ne.s32.totalorder %s564_s29, %s380_s16  ;;  %s385_s22 = sshll.u32 %s479_s17, 4  ;;  %s386_s22 = int_to_ptr.vmem [resolvable:$false] %s385_s22 }
  0x24   : > { %s387_s23 = scalar_lea.vmem %s386_s22, 256  ;;  %p388_p9 = scmp.lt.s32.totalorder %s564_s29, %s386_s22 }
  0x25   : > { %p383_p5 = pnand %p381_p2, %p367_p3  ;;  %p389_p4 = scmp.lt.s32.totalorder %s387_s23, %s380_s16 }
  0x27   : > { %p384_p11 = pneg %p383_p5  ;;  %p390_p7 = por %p389_p4, %p388_p9 }
  0x29   : > { %p391_p10 = pnand %p390_p7, %p384_p11 }
  0x2b   : > { %394 = shalt.err (!%p391_p10)
}
  0x2c   : > { %s480_s24 = smov 64   ;;  %s481_s25 = smov 4  }
  0x2d   : > { %308 = dma.hbm_to_vmem [thread:$0]  (!%p568_p0), %s562_s27, 128, %s564_s29, %s573_s2, %s480_s24, %s480_s24, %s481_s25  }
  0x2e   : > { %p137_p12 = scmp.lt.s32.totalorder %s477_s11, 3  ;;  %p675_p1 = scmp.ge.s32.totalorder %s477_s11, 1 }
  0x30   : > { %p138_p3 = pnand %p675_p1, %p137_p12 }
  0x31   : > { %s605_s26 = sand.u32 (!%p138_p3), 1, %s461_s7  }
  0x32   : > { %141 = sbr.rel (%p138_p3) target bundleno = 84 (0x54), region = 24  ;;  %s291_s28 = sshll.u32 (!%p138_p3), %s605_s26, 3 }
  0x33   : > { %s144_s3 = scalar_lea.sflag (!%p138_p3), [#allocation3], %s605_s26  ;;  %s147_s4 = scalar_lea.vmem (!%p138_p3), [#allocation2], %s291_s28 }
  0x39   : > { %448 = dma.done.wait (%p540_p8), %s144_s3, 128  }
  0x3a   : > { %450 = vsyncadd (%p540_p8), %s144_s3, 4294967168  ;;  %s292_s27 = sshll.u32 %s605_s26, 2  ;;  %s300_s2 = sshll.u32 %s469_s9, 6  ;;  %v168_v0 = vld [vmem:[%s147_s4] sm:$0xf] }
  0x3b   : > { %s165_s29 = scalar_lea.vmem [#allocation5], %s292_s27  ;;  %v293_v1 = vld [vmem:[%s147_s4 + $0x4] sm:$0xf]  ;;  %s620_s18 = scalar_lea.hbm %s668_s1, %s300_s2 }
  0x3c   : > { %s192_s30 = sshll.u32 %s165_s29, 4  ;;  %v171_v2 = vmul.f32 %v293_v1, %v168_v0  ;;  %s174_s13 = scalar_lea.sflag [#allocation4], %s605_s26  ;;  %s615_s30 = int_to_ptr.vmem [resolvable:$true] %s192_s30 }
  0x3d   : > { %s395_s15 = scalar_lea.vmem %s615_s30, 64  ;;  %p676_p9 = scmp.ne.s32.totalorder %s672_s19, 0 }
  0x3e   : > { %172 = vst [vmem:[%s165_s29] sm:$0xf] %v171_v2  ;;  %p396_p8 = scmp.ne.s32.totalorder %s615_s30, %s395_s15  ;;  %s482_s9 = smov [#allocation5]  }
  0x3f   : > { %s399_s16 = sshll.u32 %s482_s9, 4  ;;  %s400_s16 = int_to_ptr.vmem [resolvable:$false] %s399_s16 }
  0x40   : > { %p397_p11 = pnand %p396_p8, %p676_p9  ;;  %s401_s17 = scalar_lea.vmem %s400_s16, 128 }
  0x41   : > { %p402_p6 = scmp.lt.s32.totalorder %s615_s30, %s400_s16  ;;  %p403_p13 = scmp.lt.s32.totalorder %s401_s17, %s395_s15 }
  0x42   : > { %p398_p0 = pneg %p397_p11 }
  0x43   : > { %p404_p2 = por %p403_p13, %p402_p6 }
  0x45   : > { %p405_p5 = pnand %p404_p2, %p398_p0 }
  0x47   : > { %408 = shalt.err (!%p405_p5)
}
  0x48   : > { %s409_s22 = scalar_lea.hbm %s620_s18, 64  ;;  %s413_s25 = scalar_lea.hbm %s668_s1, 128 }
  0x49   : > { %p410_p4 = scmp.ne.s32.totalorder %s620_s18, %s409_s22  ;;  %p414_p12 = scmp.lt.u32.totalorder %s620_s18, %s668_s1 }
  0x4a   : > { %p415_p1 = scmp.lt.u32.totalorder %s413_s25, %s409_s22  ;;  %p417_p8 = scmp.lt.u32.totalorder %s409_s22, %s620_s18 }
  0x4b   : > { %p411_p7 = pnand %p410_p4, %p676_p9 }
  0x4c   : > { %p416_p3 = por %p415_p1, %p414_p12 }
  0x4d   : > { %p412_p10 = pneg %p411_p7 }
  0x4e   : > { %p418_p11 = por %p417_p8, %p416_p3 }
  0x50   : > { %p419_p0 = pnand %p418_p11, %p412_p10 }
  0x52   : > { %422 = shalt.err (!%p419_p0)
}
  0x53   : > { %303 = dma.vmem_to_hbm [thread:$0]  (%p676_p9), %s615_s30, 64, %s620_s18, %s174_s13  }
  0x54 PF: > { %s204_s3 = sand.u32 1, %s457_s6   ;;  %p677_p6 = scmp.ne.s32.totalorder %s673_s21, 0 }
  0x55   : > { %p678_p13 = scmp.ge.s32.totalorder %s477_s11, 2  ;;  %s205_s4 = scalar_lea.sflag [#allocation4], %s204_s3 }
  0x57   : > { %p310_p2 = pnand %p678_p13, %p677_p6 }
  0x59   : > { %452 = dma.done.wait (!%p310_p2), %s205_s4, 64  }
  0x5a   : > { %454 = vsyncadd (!%p310_p2), %s205_s4, 4294967232  ;;  %s17_s11 = sadd.s32 1, %s477_s11   ;;  %s679_s6 = smov %s461_s7 }
  0x5b   : > { %p14_p5 = scmp.ge.s32.totalorder %s17_s11, 4   ;;  %s680_s7 = smov %s465_s8 }
  0x5c   : > { %s681_s8 = smov %s549_s20  ;;  %s682_s9 = smov %s473_s10 }
  0x5d   : > { %s683_s10 = smov %s685_s14  ;;  %16 = sbr.rel (!%p14_p5) target bundleno = 6 (0x6), region = 70 }
  0x64   :  { %210 = vsyncpa [#allocation3], 1 }
  0x65   :  { %212 = vsyncpa [#allocation3 + $0x1], 1 }
  0x66   :  { %213 = vsyncpa [#allocation4], 1 }
  0x67   :  { %215 = vsyncpa [#allocation4 + $0x1], 1 }

</bundles_post_ra>
